<compile_context>
chip_gen: v6e
topology: v6e:2x2x1
jax: 0.10.0
libtpu: 0.0.40
codegen_flags: <defaults>
</compile_context>

<pallas_src>
import functools

import jax
import jax.numpy as jnp
from jax.experimental import pallas as pl
from jax.experimental.pallas import tpu as pltpu


def _head(pooled_f32, w1_ref, b1_ref, w2_ref, b2_ref, o_ref):
    """fc1 -> tanh -> fc2 -> log_softmax, all in float32, cast to output dtype."""
    h = jnp.tanh(
        jnp.dot(pooled_f32, w1_ref[...], preferred_element_type=jnp.float32)
        + b1_ref[...])
    # TODO(synk): dropout is not applied (module constructed with dropout=None).
    logits = (jnp.dot(h, w2_ref[...], preferred_element_type=jnp.float32)
              + b2_ref[...])
    mx = jnp.max(logits, axis=-1, keepdims=True)
    z = logits - mx
    lse = jnp.log(jnp.sum(jnp.exp(z), axis=-1, keepdims=True))
    o_ref[...] = (z - lse).astype(o_ref.dtype)


def _masked_kernel(x_ref, m_ref, cnt_ref, w1_ref, b1_ref, w2_ref, b2_ref,
                   o_ref, acc_ref, *, seq_len, time_tile, mask_time_major):
    # x_ref:   (TT, TB, C)   encoder output tile (native dtype)
    # m_ref:   (TT, TB) time-major  or  (TB, TT) batch-major validity mask
    # cnt_ref: (TB, 1) f32   per-row valid-token count (precomputed in wrapper)
    # acc_ref: (TB, C) f32   running masked sum over time
    t = pl.program_id(1)
    nt = -(-seq_len // time_tile)                 # static
    rem = seq_len - (nt - 1) * time_tile          # static: valid rows, last block

    @pl.when(t == 0)
    def _init():
        acc_ref[...] = jnp.zeros_like(acc_ref)

    def accumulate(rows):
        x = x_ref[...] if rows == time_tile else x_ref[0:rows, :, :]
        if mask_time_major:
            mt = m_ref[...] if rows == time_tile else m_ref[0:rows, :]
        else:
            mt = m_ref[...].T                      # (TB, TT) -> (TT, TB)
            if rows != time_tile:
                mt = mt[0:rows]
        # NOTE(perf/v7x): if this mul+reduce materializes a tile-sized temp the
        # wrapper's VMEM budget already reserves headroom for it.
        acc_ref[...] += jnp.sum(x * mt[:, :, None], axis=0, dtype=jnp.float32)

    if rem == time_tile:                           # time tile divides T exactly
        accumulate(time_tile)
    else:
        @pl.when(t < nt - 1)
        def _full_block():
            accumulate(time_tile)

        @pl.when(t == nt - 1)
        def _tail_block():
            accumulate(rem)

    @pl.when(t == nt - 1)
    def _finalize():
        # All-padded rows divide by zero, exactly like the PyTorch module.
        pooled = acc_ref[...] / cnt_ref[...]
        _head(pooled, w1_ref, b1_ref, w2_ref, b2_ref, o_ref)


def _unmasked_kernel(x_ref, w1_ref, b1_ref, w2_ref, b2_ref, o_ref, acc_ref, *,
                     seq_len, time_tile):
    # No mask: plain sum over time, scale by 1/T at finalize.
    t = pl.program_id(1)
    nt = -(-seq_len // time_tile)
    rem = seq_len - (nt - 1) * time_tile

    @pl.when(t == 0)
    def _init():
        acc_ref[...] = jnp.zeros_like(acc_ref)

    def accumulate(rows):
        x = x_ref[...] if rows == time_tile else x_ref[0:rows, :, :]
        acc_ref[...] += jnp.sum(x, axis=0, dtype=jnp.float32)

    if rem == time_tile:
        accumulate(time_tile)
    else:
        @pl.when(t < nt - 1)
        def _full_block():
            accumulate(time_tile)

        @pl.when(t == nt - 1)
        def _tail_block():
            accumulate(rem)

    @pl.when(t == nt - 1)
    def _finalize():
        pooled = acc_ref[...] / jnp.float32(seq_len)
        _head(pooled, w1_ref, b1_ref, w2_ref, b2_ref, o_ref)


def _tpu_generation():
    """Best-effort TPU generation detection -> (name, tensorcores/chip, VMEM bytes)."""
    kind = ""
    try:
        kind = (getattr(jax.devices()[0], "device_kind", "") or "").lower()
    except Exception:
        pass
    if "v5 lite" in kind or "v5e" in kind or "v5lite" in kind:
        return "v5e", 1, 128 << 20
    if "v6" in kind:
        return "v6e", 1, 128 << 20
    if "v4" in kind:
        return "v4", 2, 128 << 20
    if "v5p" in kind or "v5" in kind:
        return "v5p", 2, 128 << 20
    if "7" in kind:
        return "v7x", 2, 64 << 20
    return "unknown", 1, 64 << 20


def _round_up(v, g):
    return ((v + g - 1) // g) * g


def mean_pool_gating_network(encoder_out, encoder_padding_mask, w1, b1, w2, b2,
                             *, batch_tile=None, time_tile=None):
    """Fused masked-mean-pool + fc1/tanh/fc2/log_softmax gating network.

    encoder_out: (T, B, C); encoder_padding_mask: (B, T) bool (True=pad) or None.
    w1: (C, C), b1: (C,)   fc1 in PyTorch (out, in) convention
    w2: (E, C), b2: (E,)   fc2 in PyTorch (out, in) convention
    batch_tile / time_tile: optional overrides for testing / tuning; must
      respect TPU tiling rules (batch_tile multiple of the sublane granule or
      == B, time_tile multiple of 128 or == T).
    Returns (B, E) log-probabilities, dtype == encoder_out.dtype.
    NOTE: rows with every position padded divide by zero (inf/nan), exactly
    like the PyTorch module.
    """
    T, B, C = encoder_out.shape
    E = w2.shape[0]
    dt = encoder_out.dtype
    itemsize = jnp.dtype(dt).itemsize

    gen, num_cores, phys_vmem = _tpu_generation()
    # v7x streams ~3.2 TB/s per core -> bigger tiles amortize the ~0.35us/step
    # overhead; its 64 MiB VMEM is covered by single-buffering the weights.
    tile_budget = (12 << 20) if gen == "v7x" else (8 << 20)

    granule = {4: 8, 2: 16, 1: 32}.get(itemsize, 8)     # sublane rows per dtype

    # ---- batch tile ------------------------------------------------------
    if batch_tile is not None:
        TB = min(int(batch_tile), B)
    else:
        tb_cap = tile_budget // max(1, min(T, 128) * C * itemsize)
        tb_cap = max(granule, (tb_cap // granule) * granule)
        if num_cores > 1 and B > granule:
            # >= num_cores batch tiles so the parallel axis feeds every core
            tb_pref = _round_up(-(-B // num_cores), granule)
        else:
            tb_pref = B                                   # one contiguous slab
        TB = min(tb_pref, tb_cap)
        if TB >= B:
            TB = B
    nb = -(-B // TB)

    # ---- time tile (cdiv grid; tail handled in-kernel, never a huge block) -
    if time_tile is not None:
        TT = min(int(time_tile), T)
    else:
        tt_cap = tile_budget // max(1, TB * C * itemsize)
        if T <= tt_cap:
            TT = T
        else:
            TT = min(max(128, (tt_cap // 128) * 128), T)
    nt = -(-T // TT)

    # ---- head parameters: keep fc1/fc2 in float32 (parameter precision) ----
    w1t = jnp.transpose(w1).astype(jnp.float32)           # (C, C): x @ W1.T
    w2t = jnp.transpose(w2).astype(jnp.float32)           # (C, E): x @ W2.T
    b1r = jnp.reshape(b1, (1, C)).astype(jnp.float32)
    b2r = jnp.reshape(b2, (1, E)).astype(jnp.float32)

    weights_bytes = (C * C + C * E + C + E) * 4
    resident_kwargs = {}
    if weights_bytes > (2 << 20):
        # Single-buffer the resident weights: constant index_map means they are
        # fetched once, so a second buffer is pure VMEM waste (matters on v7x).
        resident_kwargs = dict(pipeline_mode=pl.Buffered(1))
    # TODO(synk): for very large embed_dim (C*C*4 approaching VMEM) emit pooled
    # (B, C) from the kernel instead and run the tiny head in plain XLA.

    x_spec = pl.BlockSpec((TT, TB, C), lambda b, t: (t, b, 0))
    w1_spec = pl.BlockSpec((C, C), lambda b, t: (0, 0), **resident_kwargs)
    b1_spec = pl.BlockSpec((1, C), lambda b, t: (0, 0), **resident_kwargs)
    w2_spec = pl.BlockSpec((C, E), lambda b, t: (0, 0), **resident_kwargs)
    b2_spec = pl.BlockSpec((1, E), lambda b, t: (0, 0), **resident_kwargs)
    out_spec = pl.BlockSpec((TB, E), lambda b, t: (b, 0))

    if encoder_padding_mask is None:
        kernel = functools.partial(_unmasked_kernel, seq_len=T, time_tile=TT)
        in_specs = [x_spec, w1_spec, b1_spec, w2_spec, b2_spec]
        args = (encoder_out, w1t, b1r, w2t, b2r)
        mask_hbm_bytes = 0
        mask_tile_bytes = 0
    else:
        valid_bt = jnp.logical_not(encoder_padding_mask)                  # (B, T)
        cnt = jnp.sum(valid_bt, axis=1, keepdims=True).astype(jnp.float32)
        mask_time_major = (nb == 1)
        if mask_time_major:
            valid = valid_bt.T.astype(dt)                                 # (T, B)
            m_spec = pl.BlockSpec((TT, TB), lambda b, t: (t, b))
        else:
            valid = valid_bt.astype(dt)                                   # (B, T)
            m_spec = pl.BlockSpec((TB, TT), lambda b, t: (b, t))
        cnt_spec = pl.BlockSpec((TB, 1), lambda b, t: (b, 0))
        kernel = functools.partial(_masked_kernel, seq_len=T, time_tile=TT,
                                   mask_time_major=mask_time_major)
        in_specs = [x_spec, m_spec, cnt_spec, w1_spec, b1_spec, w2_spec, b2_spec]
        args = (encoder_out, valid, cnt, w1t, b1r, w2t, b2r)
        mask_hbm_bytes = B * T * itemsize
        mask_tile_bytes = TT * TB * itemsize

    # ---- VMEM budget / limit ----------------------------------------------
    x_tile = TT * TB * C * itemsize
    weight_bufs = 1 if resident_kwargs else 2
    need = (2 * x_tile + 2 * mask_tile_bytes + weight_bufs * weights_bytes
            + 2 * TB * max(E, 128) * itemsize + 2 * TB * 128 * 4
            + TB * C * 4
            + x_tile)            # headroom for the reduce's possible f32 temp
    base_limit = (56 << 20) if gen == "v7x" else (48 << 20)
    vmem_limit = int(min(phys_vmem - (8 << 20), max(base_limit, need + (8 << 20))))

    flops = 2 * T * B * C + 2 * B * C * C + 2 * B * C * E
    transcendentals = B * (C + E)
    bytes_accessed = (T * B * C * itemsize + mask_hbm_bytes + weights_bytes
                      + B * E * itemsize + B * 4)

    return pl.pallas_call(
        kernel,
        out_shape=jax.ShapeDtypeStruct((B, E), dt),
        grid_spec=pltpu.PrefetchScalarGridSpec(
            num_scalar_prefetch=0,
            grid=(nb, nt),
            in_specs=in_specs,
            out_specs=out_spec,
            scratch_shapes=[pltpu.VMEM((TB, C), jnp.float32)],
        ),
        compiler_params=pltpu.CompilerParams(
            dimension_semantics=("parallel", "arbitrary"),
            vmem_limit_bytes=vmem_limit,
        ),
        cost_estimate=pl.CostEstimate(
            flops=flops,
            transcendentals=transcendentals,
            bytes_accessed=bytes_accessed,
        ),
    )(*args)


def _reference(encoder_out, encoder_padding_mask, w1, b1, w2, b2):
    # pure-JAX reference mirroring the PyTorch forward
    x = jnp.transpose(encoder_out, (1, 0, 2)).astype(jnp.float32)
    if encoder_padding_mask is not None:
        x = jnp.where(encoder_padding_mask[:, :, None], 0.0, x)
        ntok = jnp.sum(~encoder_padding_mask, axis=1,
                       keepdims=True).astype(jnp.float32)
        pooled = jnp.sum(x, axis=1) / ntok
    else:
        pooled = jnp.mean(x, axis=1)
    h = jnp.tanh(pooled @ w1.T.astype(jnp.float32) + b1.astype(jnp.float32))
    logits = h @ w2.T.astype(jnp.float32) + b2.astype(jnp.float32)
    return jax.nn.log_softmax(logits, axis=-1).astype(encoder_out.dtype)


if __name__ == "__main__":
    key = jax.random.PRNGKey(0)

    def make_params(k, C, E):
        k1, k2, k3, k4 = jax.random.split(k, 4)
        bound = 1.0 / (C ** 0.5)
        w1 = jax.random.uniform(k1, (C, C), minval=-bound, maxval=bound, dtype=jnp.float32)
        b1 = jax.random.uniform(k2, (C,), minval=-bound, maxval=bound, dtype=jnp.float32)
        w2 = jax.random.uniform(k3, (E, C), minval=-bound, maxval=bound, dtype=jnp.float32)
        b2 = jax.random.uniform(k4, (E,), minval=-bound, maxval=bound, dtype=jnp.float32)
        return w1, b1, w2, b2

    # ---- tests 1/2: small shapes, single grid step, time-major mask path ----
    T, B, C, E = 8, 2, 32, 4
    k_x, k_p, key = jax.random.split(key, 3)
    x = jax.random.normal(k_x, (T, B, C), dtype=jnp.float32)
    pad = jnp.zeros((B, T), dtype=bool).at[1, T - 3:].set(True)
    w1, b1, w2, b2 = make_params(k_p, C, E)

    out = jax.block_until_ready(mean_pool_gating_network(x, pad, w1, b1, w2, b2))
    ref = _reference(x, pad, w1, b1, w2, b2)
    assert out.shape == (B, E) and out.dtype == x.dtype
    assert jnp.allclose(out, ref, atol=1e-5, rtol=1e-5), "masked small-shape mismatch"

    out = jax.block_until_ready(mean_pool_gating_network(x, None, w1, b1, w2, b2))
    ref = _reference(x, None, w1, b1, w2, b2)
    assert jnp.allclose(out, ref, atol=1e-5, rtol=1e-5), "unmasked small-shape mismatch"

    # ---- tests 3/4: forced multi-tile grid (nb=2, nt=2), unaligned T, ragged B
    T, B, C, E = 200, 12, 128, 8
    k_x, k_p, key = jax.random.split(key, 3)
    x = jax.random.normal(k_x, (T, B, C), dtype=jnp.float32)
    lengths = 1 + (jnp.arange(B) * 37) % T
    pad = jnp.arange(T)[None, :] >= lengths[:, None]             # (B, T), True = pad
    w1, b1, w2, b2 = make_params(k_p, C, E)

    out = jax.block_until_ready(
        mean_pool_gating_network(x, pad, w1, b1, w2, b2, batch_tile=8, time_tile=128))
    ref = _reference(x, pad, w1, b1, w2, b2)
    assert jnp.allclose(out, ref, atol=1e-3, rtol=1e-3), "masked multi-tile mismatch"

    out = jax.block_until_ready(
        mean_pool_gating_network(x, None, w1, b1, w2, b2, batch_tile=8, time_tile=128))
    ref = _reference(x, None, w1, b1, w2, b2)
    assert jnp.allclose(out, ref, atol=1e-3, rtol=1e-3), "unmasked multi-tile mismatch"

    print("KERNEL_OK")
</pallas_src>

<mosaic_0001>
module attributes {stable_mosaic.version = 11 : i64} {
  func.func @_masked_kernel(%arg0: i32, %arg1: i32, %arg2: memref<8x2x32xf32, #tpu.memory_space<vmem>>, %arg3: memref<8x2xf32, #tpu.memory_space<vmem>>, %arg4: memref<2x1xf32, #tpu.memory_space<vmem>>, %arg5: memref<32x32xf32, #tpu.memory_space<vmem>>, %arg6: memref<1x32xf32, #tpu.memory_space<vmem>>, %arg7: memref<32x4xf32, #tpu.memory_space<vmem>>, %arg8: memref<1x4xf32, #tpu.memory_space<vmem>>, %arg9: memref<2x4xf32, #tpu.memory_space<vmem>>, %arg10: memref<2x32xf32, #tpu.memory_space<vmem>>) attributes {dimension_semantics = [#tpu.dimension_semantics<parallel>, #tpu.dimension_semantics<arbitrary>], iteration_bounds = array<i64: 1, 1>, scalar_prefetch = 0 : i64, scratch_operands = 1 : i64, tpu.core_type = #tpu.core_type<tc>, window_params = [{transform_indices = @transform_0, window_bounds = array<i64: 8, 2, 32>}, {transform_indices = @transform_1, window_bounds = array<i64: 8, 2>}, {transform_indices = @transform_2, window_bounds = array<i64: 2, 1>}, {pipeline_mode = #tpu.pipeline_mode<synchronous>, transform_indices = @transform_3, window_bounds = array<i64: 32, 32>}, {pipeline_mode = #tpu.pipeline_mode<synchronous>, transform_indices = @transform_4, window_bounds = array<i64: 1, 32>}, {pipeline_mode = #tpu.pipeline_mode<synchronous>, transform_indices = @transform_5, window_bounds = array<i64: 32, 4>}, {pipeline_mode = #tpu.pipeline_mode<synchronous>, transform_indices = @transform_6, window_bounds = array<i64: 1, 4>}, {transform_indices = @transform_7, window_bounds = array<i64: 2, 4>}]} {
    %c0_i32 = arith.constant 0 : i32
    %0 = arith.cmpi eq, %arg1, %c0_i32 : i32
    %1 = arith.extui %0 : i1 to i32
    %c0_i32_0 = arith.constant 0 : i32
    %2 = arith.cmpi ne, %1, %c0_i32_0 : i32
    scf.if %2 {
      %cst_11 = arith.constant 0.000000e+00 : f32
      %15 = vector.broadcast %cst_11 : f32 to vector<2x32xf32>
      %c0_12 = arith.constant 0 : index
      %c0_13 = arith.constant 0 : index
      %16 = vector.load %arg10[%c0_12, %c0_13] : memref<2x32xf32, #tpu.memory_space<vmem>>, vector<2x32xf32>
      tpu.vector_store %arg10[%c0_12, %c0_13], %15 {strides = array<i32>} : memref<2x32xf32, #tpu.memory_space<vmem>>, vector<2x32xf32>,
    } else {
    }
    %c0 = arith.constant 0 : index
    %c0_1 = arith.constant 0 : index
    %c0_2 = arith.constant 0 : index
    %3 = vector.load %arg2[%c0, %c0_1, %c0_2] : memref<8x2x32xf32, #tpu.memory_space<vmem>>, vector<8x2x32xf32>
    %c0_3 = arith.constant 0 : index
    %c0_4 = arith.constant 0 : index
    %4 = vector.load %arg3[%c0_3, %c0_4] : memref<8x2xf32, #tpu.memory_space<vmem>>, vector<8x2xf32>
    %c0_5 = arith.constant 0 : index
    %c0_6 = arith.constant 0 : index
    %5 = vector.load %arg10[%c0_5, %c0_6] : memref<2x32xf32, #tpu.memory_space<vmem>>, vector<2x32xf32>
    %6 = vector.shape_cast %4 : vector<8x2xf32> to vector<8x2x1xf32>
    %7 = vector.broadcast %6 : vector<8x2x1xf32> to vector<8x2x32xf32>
    %8 = arith.mulf %3, %7 : vector<8x2x32xf32>
    %cst = arith.constant dense<0.000000e+00> : vector<2x32xf32>
    %9 = vector.multi_reduction <add>, %8, %cst [0] : vector<8x2x32xf32> to vector<2x32xf32>
    %10 = arith.addf %5, %9 : vector<2x32xf32>
    %c0_7 = arith.constant 0 : index
    %c0_8 = arith.constant 0 : index
    %11 = vector.load %arg10[%c0_7, %c0_8] : memref<2x32xf32, #tpu.memory_space<vmem>>, vector<2x32xf32>
    tpu.vector_store %arg10[%c0_7, %c0_8], %10 {strides = array<i32>} : memref<2x32xf32, #tpu.memory_space<vmem>>, vector<2x32xf32>,
    %c0_i32_9 = arith.constant 0 : i32
    %12 = arith.cmpi eq, %arg1, %c0_i32_9 : i32
    %13 = arith.extui %12 : i1 to i32
    %c0_i32_10 = arith.constant 0 : i32
    %14 = arith.cmpi ne, %13, %c0_i32_10 : i32
    scf.if %14 {
      %c0_11 = arith.constant 0 : index
      %c0_12 = arith.constant 0 : index
      %15 = vector.load %arg10[%c0_11, %c0_12] : memref<2x32xf32, #tpu.memory_space<vmem>>, vector<2x32xf32>
      %c0_13 = arith.constant 0 : index
      %c0_14 = arith.constant 0 : index
      %16 = vector.load %arg4[%c0_13, %c0_14] : memref<2x1xf32, #tpu.memory_space<vmem>>, vector<2x1xf32>
      %17 = vector.broadcast %16 : vector<2x1xf32> to vector<2x32xf32>
      %18 = arith.divf %15, %17 : vector<2x32xf32>
      %c0_15 = arith.constant 0 : index
      %c0_16 = arith.constant 0 : index
      %19 = vector.load %arg5[%c0_15, %c0_16] : memref<32x32xf32, #tpu.memory_space<vmem>>, vector<32x32xf32>
      %cst_17 = arith.constant dense<0.000000e+00> : vector<2x32xf32>
      %20 = tpu.matmul %18, %19, %cst_17 {dimension_numbers = #tpu.dot_dimension_numbers<[1], [0], [0], [1], [0, 0, 1, 1], [], []>} : vector<2x32xf32>, vector<32x32xf32>, vector<2x32xf32> -> vector<2x32xf32>
      %c0_18 = arith.constant 0 : index
      %c0_19 = arith.constant 0 : index
      %21 = vector.load %arg6[%c0_18, %c0_19] : memref<1x32xf32, #tpu.memory_space<vmem>>, vector<1x32xf32>
      %22 = vector.broadcast %21 : vector<1x32xf32> to vector<2x32xf32>
      %23 = arith.addf %20, %22 : vector<2x32xf32>
      %24 = math.tanh %23 : vector<2x32xf32>
      %c0_20 = arith.constant 0 : index
      %c0_21 = arith.constant 0 : index
      %25 = vector.load %arg7[%c0_20, %c0_21] : memref<32x4xf32, #tpu.memory_space<vmem>>, vector<32x4xf32>
      %cst_22 = arith.constant dense<0.000000e+00> : vector<2x4xf32>
      %26 = tpu.matmul %24, %25, %cst_22 {dimension_numbers = #tpu.dot_dimension_numbers<[1], [0], [0], [1], [0, 0, 1, 1], [], []>} : vector<2x32xf32>, vector<32x4xf32>, vector<2x4xf32> -> vector<2x4xf32>
      %c0_23 = arith.constant 0 : index
      %c0_24 = arith.constant 0 : index
      %27 = vector.load %arg8[%c0_23, %c0_24] : memref<1x4xf32, #tpu.memory_space<vmem>>, vector<1x4xf32>
      %28 = vector.broadcast %27 : vector<1x4xf32> to vector<2x4xf32>
      %29 = arith.addf %26, %28 : vector<2x4xf32>
      %cst_25 = arith.constant dense<0xFF800000> : vector<2xf32>
      %30 = vector.multi_reduction <maximumf>, %29, %cst_25 [1] : vector<2x4xf32> to vector<2xf32>
      %31 = vector.shape_cast %30 : vector<2xf32> to vector<2x1xf32>
      %32 = vector.broadcast %31 : vector<2x1xf32> to vector<2x4xf32>
      %33 = arith.subf %29, %32 : vector<2x4xf32>
      %34 = math.exp %33 : vector<2x4xf32>
      %cst_26 = arith.constant dense<0.000000e+00> : vector<2xf32>
      %35 = vector.multi_reduction <add>, %34, %cst_26 [1] : vector<2x4xf32> to vector<2xf32>
      %36 = vector.shape_cast %35 : vector<2xf32> to vector<2x1xf32>
      %37 = math.log %36 : vector<2x1xf32>
      %38 = vector.broadcast %37 : vector<2x1xf32> to vector<2x4xf32>
      %39 = arith.subf %33, %38 : vector<2x4xf32>
      %c0_27 = arith.constant 0 : index
      %c0_28 = arith.constant 0 : index
      %40 = vector.load %arg9[%c0_27, %c0_28] : memref<2x4xf32, #tpu.memory_space<vmem>>, vector<2x4xf32>
      tpu.vector_store %arg9[%c0_27, %c0_28], %39 {strides = array<i32>} : memref<2x4xf32, #tpu.memory_space<vmem>>, vector<2x4xf32>,
    } else {
    }
    return
  }
  func.func @transform_0(%arg0: i32, %arg1: i32) -> (i32, i32, i32) {
    %c0_i32 = arith.constant 0 : i32
    %c0_i32_0 = arith.constant 0 : i32
    return %arg1, %arg0, %c0_i32 : i32, i32, i32
  }
  func.func @transform_1(%arg0: i32, %arg1: i32) -> (i32, i32) {
    %c0_i32 = arith.constant 0 : i32
    return %arg1, %arg0 : i32, i32
  }
  func.func @transform_2(%arg0: i32, %arg1: i32) -> (i32, i32) {
    %c0_i32 = arith.constant 0 : i32
    %c0_i32_0 = arith.constant 0 : i32
    return %arg0, %c0_i32 : i32, i32
  }
  func.func @transform_3(%arg0: i32, %arg1: i32) -> (i32, i32) {
    %c0_i32 = arith.constant 0 : i32
    %c0_i32_0 = arith.constant 0 : i32
    %c0_i32_1 = arith.constant 0 : i32
    return %c0_i32, %c0_i32_0 : i32, i32
  }
  func.func @transform_4(%arg0: i32, %arg1: i32) -> (i32, i32) {
    %c0_i32 = arith.constant 0 : i32
    %c0_i32_0 = arith.constant 0 : i32
    %c0_i32_1 = arith.constant 0 : i32
    return %c0_i32, %c0_i32_0 : i32, i32
  }
  func.func @transform_5(%arg0: i32, %arg1: i32) -> (i32, i32) {
    %c0_i32 = arith.constant 0 : i32
    %c0_i32_0 = arith.constant 0 : i32
    %c0_i32_1 = arith.constant 0 : i32
    return %c0_i32, %c0_i32_0 : i32, i32
  }
  func.func @transform_6(%arg0: i32, %arg1: i32) -> (i32, i32) {
    %c0_i32 = arith.constant 0 : i32
    %c0_i32_0 = arith.constant 0 : i32
    %c0_i32_1 = arith.constant 0 : i32
    return %c0_i32, %c0_i32_0 : i32, i32
  }
  func.func @transform_7(%arg0: i32, %arg1: i32) -> (i32, i32) {
    %c0_i32 = arith.constant 0 : i32
    %c0_i32_0 = arith.constant 0 : i32
    return %arg0, %c0_i32 : i32, i32
  }
}

</mosaic_0001>

<bundles_post_ra>
// kernel: tpu_custom_call.1
= control target key start
LH: loop header
LB: loop body
LE: loop exit
PB: predicated region body
PF: predicated region fallthrough
CT: control target
= control target key end

     0   :  { %v43_v0 = vlaneseq  ;;  %v406_v1 = vmov 0   ;;  %s539_s0 = inlined_call_operand.vmem [shape: f32[8,2,32], index: 0, kind: input, shape index: {}]   ;;  %s540_s1 = inlined_call_operand.vmem [shape: f32[8,2], index: 1, kind: input, shape index: {}]   ;;  %s541_s2 = inlined_call_operand.vmem [shape: f32[2,1], index: 2, kind: input, shape index: {}]   ;;  %s542_s3 = inlined_call_operand.vmem [shape: f32[32,32], index: 3, kind: input, shape index: {}]   ;;  %s543_s4 = inlined_call_operand.vmem [shape: f32[1,32], index: 4, kind: input, shape index: {}]   ;;  %s544_s5 = inlined_call_operand.vmem [shape: f32[32,4], index: 5, kind: input, shape index: {}]   ;;  %s545_s6 = inlined_call_operand.vmem [shape: f32[1,4], index: 6, kind: input, shape index: {}]   ;;  %s546_s7 = inlined_call_operand.hbm [shape: f32[2,4], index: 7, kind: output, shape index: {}]  }
   0x1   :  { %375 = vset.pattern.permute.xlu0 %v406_v1  ;;  %v41_v3 = vld [vmem:[%s540_s1] sm:$0xff] }
   0x2   :  { %v44_v2 = vshrl.u32 %v43_v0, 7 }
   0x3   :  { %12 = vsyncpa [#allocation4], 0  ;;  %vm31_vm0 = vcmask 254976   ;;  %v407_v14 = vmov 0.0   ;;  %v129_v20 = vld [vmem:[%s541_s2] sm:$0x3] }
   0x4   :  { %v59_v4 = vsub.s32 2, %v44_v2  ;;  %v45_v5 = vsub.s32 0, %v44_v2  ;;  %v66_v6 = vsub.s32 3, %v44_v2  ;;  %v52_v7 = vsub.s32 1, %v44_v2  ;;  %32 = vst.msk [vmem:[#allocation2] sm:$0x3] %vm31_vm0, %v407_v14  ;;  %349 = vmatprep.subr.mxu0 %v407_v14  ;;  %360 = vmatprep.subr.mxu1 %v407_v14 }
   0x5   :  { %v80_v10 = vsub.s32 5, %v44_v2  ;;  %v73_v13 = vsub.s32 4, %v44_v2  ;;  %v87_v17 = vsub.s32 6, %v44_v2  ;;  %v94_v19 = vsub.s32 7, %v44_v2  ;;  %v140_v21 = vld [vmem:[%s542_s3 + $0x18] sm:$0xff]  ;;  %v139_v22 = vld [vmem:[%s542_s3 + $0x10] sm:$0xff] }
   0x6   :  { %v60_v8 = vrot.slane %v41_v3, %v59_v4  ;;  %v46_v9 = vrot.slane %v41_v3, %v45_v5  ;;  %v67_v11 = vrot.slane %v41_v3, %v66_v6  ;;  %v53_v12 = vrot.slane %v41_v3, %v52_v7  ;;  %350 = vmatpush3.msra.mxu0 %v140_v21  ;;  %v138_v24 = vld [vmem:[%s542_s3 + $0x8] sm:$0xff]  ;;  %v137_v25 = vld [vmem:[%s542_s3] sm:$0xff]  ;;  %v226_v7 = vld [vmem:[%s544_s5 + $0x18] sm:$0xff] }
   0x7   :  { %v81_v15 = vrot.slane %v41_v3, %v80_v10  ;;  %v74_v16 = vrot.slane %v41_v3, %v73_v13  ;;  %v88_v18 = vrot.slane %v41_v3, %v87_v17  ;;  %vm408_vm1 = vmmov 0   ;;  %351 = vmatprep.subr.mxu0 %v407_v14  ;;  %v33_v28 = vld [vmem:[%s539_s0] sm:$0x3]  ;;  %v35_v29 = vld [vmem:[%s539_s0 + $0x4] sm:$0x3]  ;;  %361 = vmatpush3.msra.mxu1 %v226_v7 }
   0x8   :  { %62 = vbcast.lane.b32.xlu1 %v60_v8, 256  ;;  %48 = vbcast.lane.b32.xlu0 %v46_v9, 256  ;;  %v95_v23 = vrot.slane %v41_v3, %v94_v19  ;;  %v36_v30 = vld [vmem:[%s539_s0 + $0x6] sm:$0x3]  ;;  %v34_v31 = vld [vmem:[%s539_s0 + $0x2] sm:$0x3] }
   0x9   :  { %357 = vmatprep.mubr.msk.f32.mxu0 %vm408_vm1, %v407_v14  ;;  %368 = vmatprep.mubr.msk.f32.mxu1 %vm408_vm1, %v407_v14  ;;  %v38_v38 = vld [vmem:[%s539_s0 + $0xa] sm:$0x3]  ;;  %v37_v39 = vld [vmem:[%s539_s0 + $0x8] sm:$0x3]  ;;  %v39_v50 = vld [vmem:[%s539_s0 + $0xc] sm:$0x3] }
   0xa   :  { %352 = vmatpush3.msra.mxu0 %v139_v22  ;;  %v40_v57 = vld [vmem:[%s539_s0 + $0xe] sm:$0x3]  ;;  %vm148_vm2 = vcmask 261120   ;;  %v225_v8 = vld [vmem:[%s544_s5 + $0x10] sm:$0xff]  ;;  %362 = vmatprep.subr.mxu1 %v407_v14  ;;  %v223_v10 = vld [vmem:[%s544_s5] sm:$0xff]  ;;  %vm307_vm3 = vcmask 25600  }
   0xb   :  { %353 = vmatprep.subr.mxu0 %v407_v14  ;;  %v42_v63 = vld [vmem:[#allocation2] sm:$0x3]  ;;  %v224_v9 = vld [vmem:[%s544_s5 + $0x8] sm:$0xff]  ;;  %363 = vmatpush3.msra.mxu1 %v225_v8 }
   0xc   :  { %69 = vbcast.lane.b32.xlu1 %v67_v11, 256  ;;  %55 = vbcast.lane.b32.xlu0 %v53_v12, 256  ;;  %v335_v11 = vld [vmem:[%s543_s4] ss:$0 sm:$0xff]  ;;  %s409_s4 = smov [#allocation3]  }
   0xd   :  { %354 = vmatpush3.msra.mxu0 %v138_v24  ;;  %364 = vmatprep.subr.mxu1 %v407_v14  ;;  %v337_v17 = vld [vmem:[%s545_s6] ss:$0 sm:$0xff]  ;;  %s327_s5 = sshll.u32 %s409_s4, 4  ;;  %s328_s5 = int_to_ptr.vmem [resolvable:$true] %s327_s5 }
   0xe   :  { %355 = vmatprep.subr.mxu0 %v407_v14  ;;  %365 = vmatpush3.msra.mxu1 %v224_v9  ;;  %s384_s6 = scalar_lea.vmem %s328_s5, 32  ;;  %p389_p1 = scmp.lt.s32.totalorder %s328_s5, %s328_s5 }
   0xf   :  { %356 = vmatpush3.msra.mxu0 %v137_v25  ;;  %366 = vmatprep.subr.mxu1 %v407_v14  ;;  %p385_p0 = scmp.ne.s32.totalorder %s328_s5, %s384_s6  ;;  %p390_p2 = scmp.lt.s32.totalorder %s384_s6, %s384_s6 }
  0x10   :  { %83 = vbcast.lane.b32.xlu1 %v81_v15, 256  ;;  %76 = vbcast.lane.b32.xlu0 %v74_v16, 256 }
  0x11   :  { %367 = vmatpush3.msra.mxu1 %v223_v10  ;;  %p391_p3 = por %p390_p2, %p389_p1 }
  0x13   :  { %p392_p4 = pnand %p391_p3, %p385_p0 }
  0x14   :  { %90 = vbcast.lane.b32.xlu1 %v88_v18, 256  ;;  %132 = vperm.xlu0 %375, %v129_v20  }
  0x18   :  { %97 = vbcast.lane.b32.xlu1 %v95_v23, 256 }
  0x7a   :  { %v63_v26 = vpop.permute.xlu1 %62  ;;  %v49_v27 = vpop.permute.xlu0 %48 }
  0x7b   :  { %v99_v32 = vmul.f32 %v49_v27, %v33_v28  ;;  %v101_v35 = vmul.f32 %v63_v26, %v35_v29 }
  0x7d   :  { %v108_v40 = vsel %vm31_vm0, %v99_v32, 0.0  ;;  %v111_v45 = vsel %vm31_vm0, %v101_v35, 0.0 }
  0x7e   :  { %v70_v33 = vpop.permute.xlu1 %69  ;;  %v56_v34 = vpop.permute.xlu0 %55 }
  0x7f   :  { %v102_v36 = vmul.f32 %v70_v33, %v36_v30  ;;  %v100_v37 = vmul.f32 %v56_v34, %v34_v31 }
  0x81   :  { %v109_v41 = vsel %vm31_vm0, %v100_v37, 0.0  ;;  %v113_v46 = vsel %vm31_vm0, %v102_v36, 0.0 }
  0x82   :  { %v110_v42 = vadd.f32 %v109_v41, %v108_v40  ;;  %v84_v43 = vpop.permute.xlu1 %83  ;;  %v77_v44 = vpop.permute.xlu0 %76 }
  0x83   :  { %v104_v47 = vmul.f32 %v84_v43, %v38_v38  ;;  %v103_v48 = vmul.f32 %v77_v44, %v37_v39 }
  0x84   :  { %v112_v49 = vadd.f32 %v111_v45, %v110_v42 }
  0x85   :  { %v117_v53 = vsel %vm31_vm0, %v104_v47, 0.0  ;;  %v115_v54 = vsel %vm31_vm0, %v103_v48, 0.0 }
  0x86   :  { %v114_v51 = vadd.f32 %v113_v46, %v112_v49  ;;  %v91_v52 = vpop.permute.xlu1 %90 }
  0x87   :  { %v105_v55 = vmul.f32 %v91_v52, %v39_v50 }
  0x88   :  { %v116_v56 = vadd.f32 %v115_v54, %v114_v51 }
  0x89   :  { %v119_v58 = vsel %vm31_vm0, %v105_v55, 0.0 }
  0x8a   :  { %v118_v59 = vadd.f32 %v117_v53, %v116_v56  ;;  %v98_v60 = vpop.permute.xlu1 %97 }
  0x8b   :  { %v106_v61 = vmul.f32 %v98_v60, %v40_v57 }
  0x8c   :  { %v120_v62 = vadd.f32 %v119_v58, %v118_v59 }
  0x8d   :  { %v121_v0 = vsel %vm31_vm0, %v106_v61, 0.0 }
  0x8e   :  { %v122_v1 = vadd.f32 %v121_v0, %v120_v62 }
  0x8f   :  { %v133_v2 = vpop.permute.xlu0 %132 }
  0x90   :  { %v123_v3 = vadd.f32 %v122_v1, %v42_v63  ;;  %376 = vrcp.f32 %v133_v2 }
  0x92   :  { %124 = vst.msk [vmem:[#allocation2] sm:$0x3] %vm31_vm0, %v123_v3 }
  0x99   :  { %v128_v5 = vld [vmem:[#allocation2] sm:$0x3] }
  0x9d   :  { %v377_v4 = vpop.eup %376 }
  0x9e   :  { %v136_v6 = vmul.f32 %v377_v4, %v128_v5 }
  0xa0   :  { %358 = vmatmul.mubr.msk.f32.vlgmr.msra.gmra.mxu0 %vm148_vm2, %v136_v6 }
 0x160   :  { %v218_v12 = vpop.f32.mrf.mxu0 }
 0x161   :  { %v219_v13 = vadd.f32 %v335_v11, %v218_v12 }
 0x162   :  { %v359_v15 = vpop.f32.mrf.mxu0 }
 0x163   :  { %378 = vtanh.f32 %v219_v13 }
 0x170   :  { %v379_v16 = vpop.eup %378 }
 0x171   :  { %369 = vmatmul.mubr.msk.f32.vlgmr.msra.gmra.mxu1 %vm148_vm2, %v379_v16 }
 0x231   :  { %v303_v18 = vpop.f32.mrf.mxu1 }
 0x232   :  { %v304_v19 = vadd.f32 %v337_v17, %v303_v18 }
 0x233   :  { %v370_v14 = vpop.f32.mrf.mxu1 }
 0x234   :  { %v308_v20 = vsel %vm307_vm3, %v304_v19, -inf }
 0x235   :  { %309 = vmax.xlane.f32.xlu0 %v308_v20 }
 0x2be   :  { %v310_v21 = vpop.xlane.xlu0 %309 }
 0x2bf   :  { %v311_v22 = vsub.f32 %v304_v19, %v310_v21 }
 0x2c1   :  { %v312_v23 = vmul.f32 1.442695, %v311_v22 }
 0x2c3   :  { %380 = vpow2.f32 %v312_v23 }
 0x2d0   :  { %v381_v24 = vpop.eup %380 }
 0x2d1   :  { %v314_v25 = vsel %vm307_vm3, %v381_v24, 0.0 }
 0x2d2   :  { %315 = vadd.xlane.f32.xlu1 %v314_v25 }
 0x35b   :  { %v316_v26 = vpop.xlane.xlu1 %315 }
 0x35c   :  { %382 = vlog2.f32 %v316_v26 }
 0x369   :  { %v383_v27 = vpop.eup %382 }
 0x36a   :  { %v318_v28 = vmul.f32 0.6931472, %v383_v27 }
 0x36c   :  { %v319_v29 = vsub.f32 %v311_v22, %v318_v28 }
 0x36e   :  { %320 = vst.msk [vmem:[#allocation3] sm:$0x3] %vm307_vm3, %v319_v29 }
 0x36f   :  { %395 = shalt.err (!%p392_p4)
}
 0x370   :  { %330 = dma.vmem_to_hbm [thread:$0]  %s328_s5, 32, %s546_s7, [#allocation4]  }
 0x371   :  { %404 = dma.done.wait [#allocation4], 32  }
 0x372   :  { %405 = vsyncadd [#allocation4], 4294967264 }
 0x373   :  { %334 = vsyncpa [#allocation4], 1 }

</bundles_post_ra>
